<compile_context>
chip_gen: v7x
topology: tpu7x:2x2x1
jax: 0.10.0
libtpu: 0.0.40
codegen_flags: <defaults>
</compile_context>

<pallas_src>
import functools
from typing import Any, NamedTuple, Tuple

import jax
import jax.numpy as jnp
from jax.experimental import pallas as pl
from jax.experimental.pallas import tpu as pltpu


def _round_up(x, m):
    return (x + m - 1) // m * m


def _tpu_vmem_capacity_bytes():
    """Per-TensorCore VMEM capacity; conservative (v7x-sized) fallback if query fails."""
    try:
        return int(pltpu.get_tpu_info().vmem_capacity_bytes)
    except Exception:
        return 64 << 20


def _tpu_num_tensorcores():
    """TensorCores addressable by one pallas_call (v7x megacore: 2; v5e/v6e: 1)."""
    try:
        info = pltpu.get_tpu_info()
        for attr in ("num_cores", "num_tensorcores", "core_count"):
            v = getattr(info, attr, None)
            if isinstance(v, int) and v > 0:
                return v
    except Exception:
        pass
    try:
        return max(1, int(getattr(jax.devices()[0], "num_cores", 1) or 1))
    except Exception:
        return 1


def _spec(shape, index_map, nbuf):
    """BlockSpec with an explicit buffer count.

    Falls back to default double-buffering if this JAX build lacks
    BlockSpec.pipeline_mode (still correct, just uses more VMEM)."""
    if nbuf == 2:
        return pl.BlockSpec(shape, index_map)
    try:
        return pl.BlockSpec(shape, index_map,
                            pipeline_mode=pl.Buffered(buffer_count=nbuf))
    except (TypeError, AttributeError):
        return pl.BlockSpec(shape, index_map)


# --------------------------------------------------------------------------------------
# Parameter packing (pad to lane-dense 128 multiples, cast to compute dtype) — do once.
# --------------------------------------------------------------------------------------

class PackedMLPParams(NamedTuple):
    weights: Tuple[Any, ...]   # [din_pad, dh_pad], compute dtype
    biases: Tuple[Any, ...]    # [1, dh_pad], float32
    d_model: int
    d_hidden: int
    dm_pad: int
    dh_pad: int
    compute_dtype: Any


def pack_mlp_block_params(weights, biases, *, compute_dtype=jnp.bfloat16):
    """Pad + cast MLPBlock params once; reuse across calls to avoid per-call HBM copies."""
    n_layer = len(weights)
    assert n_layer >= 1 and len(biases) == n_layer
    d_model = int(weights[0].shape[0])
    d_hidden = int(weights[0].shape[1])
    for l in range(n_layer):
        d_in = d_model if l == 0 else d_hidden
        assert tuple(weights[l].shape) == (d_in, d_hidden), (
            f"MLPBlock requires uniform hidden width: layer {l} weight shape "
            f"{tuple(weights[l].shape)}, expected {(d_in, d_hidden)}")
        assert biases[l].reshape(-1).shape[0] == d_hidden

    dm_pad = _round_up(d_model, 128)
    dh_pad = _round_up(d_hidden, 128)

    w_p, b_p = [], []
    for l in range(n_layer):
        d_in = d_model if l == 0 else d_hidden
        din_pad = dm_pad if l == 0 else dh_pad
        w = jnp.asarray(weights[l]).astype(compute_dtype)
        if w.shape != (din_pad, dh_pad):
            w = jnp.pad(w, ((0, din_pad - d_in), (0, dh_pad - d_hidden)))
        b = jnp.asarray(biases[l]).reshape(1, -1).astype(jnp.float32)
        if b.shape != (1, dh_pad):
            b = jnp.pad(b, ((0, 0), (0, dh_pad - d_hidden)))
        w_p.append(w)
        b_p.append(b)
    return PackedMLPParams(tuple(w_p), tuple(b_p), d_model, d_hidden,
                           dm_pad, dh_pad, jnp.dtype(compute_dtype))


# --------------------------------------------------------------------------------------
# Kernels
# --------------------------------------------------------------------------------------

def _fused_mlp_kernel(x_ref, *refs, n_layer):
    """Resident-weights path. refs = (w_0..w_{n-1}, b_0..b_{n-1}, o_ref)."""
    w_refs = refs[:n_layer]
    b_refs = refs[n_layer:2 * n_layer]
    o_ref = refs[2 * n_layer]

    h = x_ref[...]                                              # (tm, dm_pad) bf16
    for l in range(n_layer):
        w = w_refs[l][...]                                      # (din_pad, dh_pad) bf16
        y = jnp.dot(h, w, preferred_element_type=jnp.float32)   # MXU, f32 accumulate
        y = y + b_refs[l][...]                                  # (1, dh_pad) f32 bias
        if l < n_layer - 1:
            h = jnp.maximum(y, 0.0).astype(w.dtype)             # ReLU, bf16 for next MXU
        else:
            h = y
    o_ref[...] = h.astype(o_ref.dtype)


def _staged_mlp_kernel(x_ref, *refs, n_layer, din_pads):
    """HBM-resident weights path: per-layer weights double-buffered via manual DMA.

    refs = (w_hbm_0..w_hbm_{n-1}, b_0..b_{n-1}, o_ref, wbuf, sem).
    Layer-(l+1) weight DMA is overlapped with layer-l MXU work."""
    w_hbm = refs[:n_layer]
    b_refs = refs[n_layer:2 * n_layer]
    o_ref = refs[2 * n_layer]
    wbuf = refs[2 * n_layer + 1]        # VMEM (2, max_din_pad, dh_pad), compute dtype
    sem = refs[2 * n_layer + 2]         # DMA semaphores (2,)
    max_din = wbuf.shape[1]

    def _copy(l, slot):
        if din_pads[l] == max_din:
            dst = wbuf.at[slot]
        else:
            dst = wbuf.at[slot, :din_pads[l], :]
        return pltpu.make_async_copy(w_hbm[l], dst, sem.at[slot])

    _copy(0, 0).start()                 # prefetch layer 0 weights
    h = x_ref[...]
    for l in range(n_layer):
        slot = l & 1
        _copy(l, slot).wait()
        if l + 1 < n_layer:
            _copy(l + 1, 1 - slot).start()
        if din_pads[l] == max_din:
            w = wbuf[slot]
        else:
            w = wbuf[slot, :din_pads[l], :]
        y = jnp.dot(h, w, preferred_element_type=jnp.float32)
        y = y + b_refs[l][...]
        if l < n_layer - 1:
            h = jnp.maximum(y, 0.0).astype(w.dtype)
        else:
            h = y
    o_ref[...] = h.astype(o_ref.dtype)


# --------------------------------------------------------------------------------------
# Wrapper
# --------------------------------------------------------------------------------------

def mlp_block_pallas(x, weights, biases=None, *, compute_dtype=jnp.bfloat16,
                     out_dtype=None, force_stage_weights=False):
    """Fused MLPBlock forward: h = ReLU(...ReLU(x@W0+b0)...); out = h@W_{n-1}+b_{n-1}.

    x       : [..., d_model]
    weights : list of [d_in_l, d_hidden] (PyTorch weight.T) OR a PackedMLPParams
    biases  : list of [d_hidden] (ignored when weights is PackedMLPParams)
    out_dtype defaults to x.dtype; pass jnp.bfloat16 when the consumer tolerates it to
    halve output VMEM buffers and HBM writeback bytes.
    """
    if isinstance(weights, PackedMLPParams):
        params = weights
    else:
        params = pack_mlp_block_params(weights, biases, compute_dtype=compute_dtype)
    compute_dtype = params.compute_dtype
    n_layer = len(params.weights)
    d_model, d_hidden = params.d_model, params.d_hidden
    dm_p, dh_p = params.dm_pad, params.dh_pad
    out_dtype = out_dtype or x.dtype

    assert x.shape[-1] == d_model, (x.shape, d_model)
    lead_shape = x.shape[:-1]
    x2d = x.reshape(-1, d_model)
    M = x2d.shape[0]

    cbytes = jnp.dtype(compute_dtype).itemsize
    obytes = jnp.dtype(out_dtype).itemsize

    vmem_cap = _tpu_vmem_capacity_bytes()
    usable_vmem = (vmem_cap * 3) // 4          # headroom for compiler-internal scratch
    n_cores = _tpu_num_tensorcores()

    # ---- Row tile -------------------------------------------------------------------
    # Big tiles amortize per-step overhead (>=256 rows already ~85% of roofline), but the
    # live f32 intermediate (tm x dh_pad x 4B) must not squeeze VMEM (v7x: 64 MiB/TC).
    inter_budget = (4 << 20) if vmem_cap <= (64 << 20) else (8 << 20)
    tm_cap = 512
    while tm_cap > 128 and tm_cap * dh_p * 4 > inter_budget:
        tm_cap //= 2
    # Give each TensorCore at least one row tile when there is enough work to split
    # (dimension_semantics=("parallel",) then shards the row axis across cores).
    if n_cores > 1 and M > 16 * n_cores:
        per_core = _round_up(-(-M // n_cores), 16)
        tm_cap = min(tm_cap, max(16, per_core))
    tm = min(tm_cap, _round_up(M, 16))         # multiple of 16: bf16 packs 2 rows/sublane
    m_pad = _round_up(M, tm)
    grid_m = m_pad // tm

    # ---- Activation padding (skip copies when already aligned) ------------------------
    x_c = x2d.astype(compute_dtype)
    if m_pad != M or dm_p != d_model:
        x_c = jnp.pad(x_c, ((0, m_pad - M), (0, dm_p - d_model)))

    # ---- Weight residency decision -----------------------------------------------------
    din_pads = tuple(dm_p if l == 0 else dh_p for l in range(n_layer))
    max_din = max(din_pads)
    weight_bytes = sum(din_pads[l] * dh_p * cbytes for l in range(n_layer))
    bias_bytes = n_layer * dh_p * 4
    stage_weights = bool(force_stage_weights) or (weight_bytes > usable_vmem // 2)
    # TODO(synk): if even one double-buffered layer (2 * max_din_pad * dh_pad) exceeds
    # VMEM, additionally tile the staged weight over d_out/d_in inside the layer loop.

    # ---- BlockSpecs --------------------------------------------------------------------
    # 3-deep x buffering in the mem-bound regime (small features, several row tiles) to
    # hide the exposed x/o DMAs; otherwise default double-buffering.
    x_nbuf = 3 if (grid_m >= 3 and dm_p <= 512 and dh_p <= 512) else 2
    x_spec = _spec((tm, dm_p), lambda i: (i, 0), x_nbuf)
    out_spec = pl.BlockSpec((tm, dh_p), lambda i: (i, 0))

    # Params have constant index_maps -> fetched once, stay resident; Buffered(1) avoids
    # wasting a second VMEM buffer on them.
    bias_specs = [_spec((1, dh_p), lambda i: (0, 0), 1) for _ in range(n_layer)]

    if not stage_weights:
        weight_specs = [_spec((din_pads[l], dh_p), lambda i: (0, 0), 1)
                        for l in range(n_layer)]
        scratch_shapes = []
        kernel = functools.partial(_fused_mlp_kernel, n_layer=n_layer)
        weight_vmem = weight_bytes
        weight_hbm_reads = weight_bytes
    else:
        weight_specs = [pl.BlockSpec(memory_space=pl.ANY) for _ in range(n_layer)]
        scratch_shapes = [pltpu.VMEM((2, max_din, dh_p), compute_dtype),
                          pltpu.SemaphoreType.DMA((2,))]
        kernel = functools.partial(_staged_mlp_kernel, n_layer=n_layer,
                                   din_pads=din_pads)
        weight_vmem = 2 * max_din * dh_p * cbytes
        weight_hbm_reads = weight_bytes * grid_m     # re-staged per row tile

    in_specs = [x_spec] + weight_specs + bias_specs

    # ---- Cost estimate & VMEM budget ---------------------------------------------------
    flops = sum(2 * m_pad * din_pads[l] * dh_p for l in range(n_layer))
    bytes_accessed = (m_pad * dm_p * cbytes + m_pad * dh_p * obytes
                      + weight_hbm_reads + bias_bytes)
    cost = pl.CostEstimate(flops=int(flops), transcendentals=0,
                           bytes_accessed=int(bytes_accessed))

    act_bytes = x_nbuf * tm * dm_p * cbytes + 2 * tm * dh_p * obytes
    live_bytes = 2 * tm * max(dm_p, dh_p) * 4        # f32 y + previous h
    vmem_est = weight_vmem + bias_bytes + act_bytes + live_bytes
    # Always set the scoped limit explicitly (v5e defaults to 16 MiB); cap it by the
    # physical per-core capacity so we never request more than v7x's 64 MiB.
    vmem_limit = int(min(usable_vmem,
                         max(int(vmem_est * 5 // 4) + (4 << 20), 32 << 20)))

    out_p = pl.pallas_call(
        kernel,
        out_shape=jax.ShapeDtypeStruct((m_pad, dh_p), out_dtype),
        grid_spec=pltpu.PrefetchScalarGridSpec(
            num_scalar_prefetch=0,
            grid=(grid_m,),
            in_specs=in_specs,
            out_specs=out_spec,
            scratch_shapes=scratch_shapes,
        ),
        compiler_params=pltpu.CompilerParams(
            dimension_semantics=("parallel",),
            vmem_limit_bytes=vmem_limit,
        ),
        cost_estimate=cost,
    )(x_c, *params.weights, *params.biases)

    out = out_p[:M, :d_hidden]
    return out.reshape(lead_shape + (d_hidden,))


# --------------------------------------------------------------------------------------
# Reference & test harness
# --------------------------------------------------------------------------------------

def init_mlp_block_params(key, d_model, d_hidden, n_layer, dtype=jnp.float32):
    """Synthetic init matching nn.Linear shapes (weight stored transposed: [d_in, d_out])."""
    weights, biases = [], []
    for l in range(n_layer):
        d_in = d_model if l == 0 else d_hidden
        key, kw, kb = jax.random.split(key, 3)
        bound = 1.0 / jnp.sqrt(d_in)
        weights.append(jax.random.uniform(kw, (d_in, d_hidden), dtype, -bound, bound))
        biases.append(jax.random.uniform(kb, (d_hidden,), dtype, -bound, bound))
    return weights, biases


def mlp_block_reference(x, weights, biases, compute_dtype=jnp.bfloat16):
    """Pure-JAX reference mirroring the kernel's bf16-operand / f32-accumulate math."""
    lead_shape = x.shape[:-1]
    out = x.reshape(-1, x.shape[-1]).astype(compute_dtype)
    n_layer = len(weights)
    for l in range(n_layer):
        y = jnp.dot(out, weights[l].astype(compute_dtype),
                    preferred_element_type=jnp.float32)
        y = y + biases[l].astype(jnp.float32)
        if l < n_layer - 1:
            y = jnp.maximum(y, 0.0)
            out = y.astype(compute_dtype)
        else:
            out = y
    return out.astype(x.dtype).reshape(lead_shape + (weights[-1].shape[1],))


if __name__ == "__main__":
    key = jax.random.PRNGKey(0)

    # Small shapes consistent with the module: input (batch, seq, d_model).
    batch, seq, d_model, d_hidden, n_layer = 2, 8, 32, 32, 3
    key, kx = jax.random.split(key)
    x = jax.random.normal(kx, (batch, seq, d_model), jnp.float32)
    weights, biases = init_mlp_block_params(key, d_model, d_hidden, n_layer)
    ref = mlp_block_reference(x, weights, biases)

    # 1) Resident-weights path, params packed once and reused.
    packed = pack_mlp_block_params(weights, biases)
    out = jax.block_until_ready(mlp_block_pallas(x, packed))
    assert out.shape == (batch, seq, d_hidden)
    assert jnp.all(jnp.isfinite(out)), "non-finite values (resident path)"
    assert jnp.allclose(out, ref, atol=1e-2, rtol=1e-2), "mismatch (resident path)"

    # 2) HBM-staged weights path (manual double-buffered per-layer weight DMA).
    out_staged = jax.block_until_ready(
        mlp_block_pallas(x, packed, force_stage_weights=True))
    assert jnp.all(jnp.isfinite(out_staged)), "non-finite values (staged path)"
    assert jnp.allclose(out_staged, ref, atol=1e-2, rtol=1e-2), "mismatch (staged path)"

    # 3) Ragged / non-128-aligned shapes: exercises padding and a multi-tile row grid.
    b2, s2, dm2, dh2, nl2 = 3, 217, 48, 80, 2
    key, kx2, kp2 = jax.random.split(key, 3)
    x2 = jax.random.normal(kx2, (b2, s2, dm2), jnp.float32)
    w2, bs2 = init_mlp_block_params(kp2, dm2, dh2, nl2)
    out2 = jax.block_until_ready(mlp_block_pallas(x2, w2, bs2))
    ref2 = mlp_block_reference(x2, w2, bs2)
    assert out2.shape == (b2, s2, dh2)
    assert jnp.all(jnp.isfinite(out2)), "non-finite values (ragged path)"
    assert jnp.allclose(out2, ref2, atol=1e-2, rtol=1e-2), "mismatch (ragged path)"

    print("KERNEL_OK")
</pallas_src>

<mosaic_0001>
module attributes {stable_mosaic.version = 11 : i64} {
  func.func @_fused_mlp_kernel(%arg0: i32, %arg1: memref<16x128xbf16, #tpu.memory_space<vmem>>, %arg2: memref<128x128xbf16, #tpu.memory_space<vmem>>, %arg3: memref<128x128xbf16, #tpu.memory_space<vmem>>, %arg4: memref<128x128xbf16, #tpu.memory_space<vmem>>, %arg5: memref<1x128xf32, #tpu.memory_space<vmem>>, %arg6: memref<1x128xf32, #tpu.memory_space<vmem>>, %arg7: memref<1x128xf32, #tpu.memory_space<vmem>>, %arg8: memref<16x128xf32, #tpu.memory_space<vmem>>) attributes {dimension_semantics = [#tpu.dimension_semantics<parallel>], iteration_bounds = array<i64: 1>, scalar_prefetch = 0 : i64, scratch_operands = 0 : i64, tpu.core_type = #tpu.core_type<tc>, window_params = [{transform_indices = @transform_0, window_bounds = array<i64: 16, 128>}, {pipeline_mode = #tpu.pipeline_mode<synchronous>, transform_indices = @transform_1, window_bounds = array<i64: 128, 128>}, {pipeline_mode = #tpu.pipeline_mode<synchronous>, transform_indices = @transform_2, window_bounds = array<i64: 128, 128>}, {pipeline_mode = #tpu.pipeline_mode<synchronous>, transform_indices = @transform_3, window_bounds = array<i64: 128, 128>}, {pipeline_mode = #tpu.pipeline_mode<synchronous>, transform_indices = @transform_4, window_bounds = array<i64: 1, 128>}, {pipeline_mode = #tpu.pipeline_mode<synchronous>, transform_indices = @transform_5, window_bounds = array<i64: 1, 128>}, {pipeline_mode = #tpu.pipeline_mode<synchronous>, transform_indices = @transform_6, window_bounds = array<i64: 1, 128>}, {transform_indices = @transform_7, window_bounds = array<i64: 16, 128>}]} {
    %c0 = arith.constant 0 : index
    %c0_0 = arith.constant 0 : index
    %0 = vector.load %arg1[%c0, %c0_0] : memref<16x128xbf16, #tpu.memory_space<vmem>>, vector<16x128xbf16>
    %c0_1 = arith.constant 0 : index
    %c0_2 = arith.constant 0 : index
    %1 = vector.load %arg2[%c0_1, %c0_2] : memref<128x128xbf16, #tpu.memory_space<vmem>>, vector<128x128xbf16>
    %cst = arith.constant dense<0.000000e+00> : vector<16x128xf32>
    %2 = tpu.matmul %0, %1, %cst {dimension_numbers = #tpu.dot_dimension_numbers<[1], [0], [0], [1], [0, 0, 1, 1], [], []>} : vector<16x128xbf16>, vector<128x128xbf16>, vector<16x128xf32> -> vector<16x128xf32>
    %c0_3 = arith.constant 0 : index
    %c0_4 = arith.constant 0 : index
    %3 = vector.load %arg5[%c0_3, %c0_4] : memref<1x128xf32, #tpu.memory_space<vmem>>, vector<1x128xf32>
    %4 = vector.broadcast %3 : vector<1x128xf32> to vector<16x128xf32>
    %5 = arith.addf %2, %4 : vector<16x128xf32>
    %cst_5 = arith.constant 0.000000e+00 : f32
    %6 = vector.broadcast %cst_5 : f32 to vector<16x128xf32>
    %7 = arith.maximumf %5, %6 : vector<16x128xf32>
    %8 = arith.truncf %7 : vector<16x128xf32> to vector<16x128xbf16>
    %c0_6 = arith.constant 0 : index
    %c0_7 = arith.constant 0 : index
    %9 = vector.load %arg3[%c0_6, %c0_7] : memref<128x128xbf16, #tpu.memory_space<vmem>>, vector<128x128xbf16>
    %cst_8 = arith.constant dense<0.000000e+00> : vector<16x128xf32>
    %10 = tpu.matmul %8, %9, %cst_8 {dimension_numbers = #tpu.dot_dimension_numbers<[1], [0], [0], [1], [0, 0, 1, 1], [], []>} : vector<16x128xbf16>, vector<128x128xbf16>, vector<16x128xf32> -> vector<16x128xf32>
    %c0_9 = arith.constant 0 : index
    %c0_10 = arith.constant 0 : index
    %11 = vector.load %arg6[%c0_9, %c0_10] : memref<1x128xf32, #tpu.memory_space<vmem>>, vector<1x128xf32>
    %12 = vector.broadcast %11 : vector<1x128xf32> to vector<16x128xf32>
    %13 = arith.addf %10, %12 : vector<16x128xf32>
    %cst_11 = arith.constant 0.000000e+00 : f32
    %14 = vector.broadcast %cst_11 : f32 to vector<16x128xf32>
    %15 = arith.maximumf %13, %14 : vector<16x128xf32>
    %16 = arith.truncf %15 : vector<16x128xf32> to vector<16x128xbf16>
    %c0_12 = arith.constant 0 : index
    %c0_13 = arith.constant 0 : index
    %17 = vector.load %arg4[%c0_12, %c0_13] : memref<128x128xbf16, #tpu.memory_space<vmem>>, vector<128x128xbf16>
    %cst_14 = arith.constant dense<0.000000e+00> : vector<16x128xf32>
    %18 = tpu.matmul %16, %17, %cst_14 {dimension_numbers = #tpu.dot_dimension_numbers<[1], [0], [0], [1], [0, 0, 1, 1], [], []>} : vector<16x128xbf16>, vector<128x128xbf16>, vector<16x128xf32> -> vector<16x128xf32>
    %c0_15 = arith.constant 0 : index
    %c0_16 = arith.constant 0 : index
    %19 = vector.load %arg7[%c0_15, %c0_16] : memref<1x128xf32, #tpu.memory_space<vmem>>, vector<1x128xf32>
    %20 = vector.broadcast %19 : vector<1x128xf32> to vector<16x128xf32>
    %21 = arith.addf %18, %20 : vector<16x128xf32>
    %c0_17 = arith.constant 0 : index
    %c0_18 = arith.constant 0 : index
    %22 = vector.load %arg8[%c0_17, %c0_18] : memref<16x128xf32, #tpu.memory_space<vmem>>, vector<16x128xf32>
    tpu.vector_store %arg8[%c0_17, %c0_18], %21 {strides = array<i32>} : memref<16x128xf32, #tpu.memory_space<vmem>>, vector<16x128xf32>,
    return
  }
  func.func @transform_0(%arg0: i32) -> (i32, i32) {
    %c0_i32 = arith.constant 0 : i32
    %c0_i32_0 = arith.constant 0 : i32
    return %arg0, %c0_i32 : i32, i32
  }
  func.func @transform_1(%arg0: i32) -> (i32, i32) {
    %c0_i32 = arith.constant 0 : i32
    %c0_i32_0 = arith.constant 0 : i32
    %c0_i32_1 = arith.constant 0 : i32
    return %c0_i32, %c0_i32_0 : i32, i32
  }
  func.func @transform_2(%arg0: i32) -> (i32, i32) {
    %c0_i32 = arith.constant 0 : i32
    %c0_i32_0 = arith.constant 0 : i32
    %c0_i32_1 = arith.constant 0 : i32
    return %c0_i32, %c0_i32_0 : i32, i32
  }
  func.func @transform_3(%arg0: i32) -> (i32, i32) {
    %c0_i32 = arith.constant 0 : i32
    %c0_i32_0 = arith.constant 0 : i32
    %c0_i32_1 = arith.constant 0 : i32
    return %c0_i32, %c0_i32_0 : i32, i32
  }
  func.func @transform_4(%arg0: i32) -> (i32, i32) {
    %c0_i32 = arith.constant 0 : i32
    %c0_i32_0 = arith.constant 0 : i32
    %c0_i32_1 = arith.constant 0 : i32
    return %c0_i32, %c0_i32_0 : i32, i32
  }
  func.func @transform_5(%arg0: i32) -> (i32, i32) {
    %c0_i32 = arith.constant 0 : i32
    %c0_i32_0 = arith.constant 0 : i32
    %c0_i32_1 = arith.constant 0 : i32
    return %c0_i32, %c0_i32_0 : i32, i32
  }
  func.func @transform_6(%arg0: i32) -> (i32, i32) {
    %c0_i32 = arith.constant 0 : i32
    %c0_i32_0 = arith.constant 0 : i32
    %c0_i32_1 = arith.constant 0 : i32
    return %c0_i32, %c0_i32_0 : i32, i32
  }
  func.func @transform_7(%arg0: i32) -> (i32, i32) {
    %c0_i32 = arith.constant 0 : i32
    %c0_i32_0 = arith.constant 0 : i32
    return %arg0, %c0_i32 : i32, i32
  }
}

</mosaic_0001>

<bundles_post_ra>
// kernel: tpu_custom_call.1
= control target key start
LH: loop header
LB: loop body
LE: loop exit
PB: predicated region body
PF: predicated region fallthrough
CT: control target
= control target key end

     0   :  { %12 = vsyncpa [#allocation3], 0  ;;  %s899_s0 = inlined_call_operand.hbm [shape: bf16[16,128], index: 0, kind: input, shape index: {}]   ;;  %s900_s1 = inlined_call_operand.hbm [shape: bf16[128,128], index: 1, kind: input, shape index: {}]   ;;  %s901_s2 = inlined_call_operand.hbm [shape: bf16[128,128], index: 2, kind: input, shape index: {}]   ;;  %s902_s3 = inlined_call_operand.hbm [shape: bf16[128,128], index: 3, kind: input, shape index: {}]   ;;  %s903_s4 = inlined_call_operand.vmem [shape: f32[1,128], index: 4, kind: input, shape index: {}]   ;;  %s904_s5 = inlined_call_operand.vmem [shape: f32[1,128], index: 5, kind: input, shape index: {}]   ;;  %s905_s6 = inlined_call_operand.vmem [shape: f32[1,128], index: 6, kind: input, shape index: {}]   ;;  %s906_s7 = inlined_call_operand.hbm [shape: f32[16,128], index: 7, kind: output, shape index: {}]  }
   0x1   :  { %13 = vsyncpa [#allocation6], 0 }
   0x2   :  { %14 = vsyncpa [#allocation9], 0 }
   0x3   :  { %15 = vsyncpa [#allocation4], 0  ;;  %s723_s24 = smov [#allocation5]   ;;  %s724_s26 = smov [#allocation2]  }
   0x4   :  { %s33_s25 = sshll.u32 %s723_s24, 4  ;;  %s21_s27 = sshll.u32 %s724_s26, 4  ;;  %s34_s25 = int_to_ptr.vmem [resolvable:$true] %s33_s25  ;;  %s774_s27 = int_to_ptr.vmem [resolvable:$true] %s21_s27 }
   0x5   :  { %s605_s30 = scalar_lea.hbm %s900_s1, 1024 }
   0x6   :  { %p606_p0 = scmp.ne.s32.totalorder %s900_s1, %s605_s30  ;;  %p609_p1 = scmp.lt.u32.totalorder %s605_s30, %s900_s1 }
   0x8   :  { %p611_p2 = pnand %p609_p1, %p606_p0 }
   0xa   :  { %614 = shalt.err (!%p611_p2)
}
   0xb   :  { %s615_s12 = scalar_lea.vmem %s34_s25, 1024  ;;  %p620_p4 = scmp.lt.s32.totalorder %s34_s25, %s34_s25 }
   0xc   :  { %p616_p3 = scmp.ne.s32.totalorder %s34_s25, %s615_s12  ;;  %p621_p5 = scmp.lt.s32.totalorder %s615_s12, %s615_s12 }
   0xe   :  { %p622_p6 = por %p621_p5, %p620_p4 }
  0x10   :  { %p623_p7 = pnand %p622_p6, %p616_p3 }
  0x12   :  { %626 = shalt.err (!%p623_p7)
}
  0x13   :  { %s725_s13 = smov 64   ;;  %s726_s14 = smov 4  }
  0x14   :  { %39 = dma.hbm_to_vmem [thread:$0]  %s900_s1, 1024, %s34_s25, [#allocation6], %s725_s13, %s725_s13, %s726_s14  }
  0x15   :  { %s627_s19 = scalar_lea.hbm %s899_s0, 128 }
  0x16   :  { %p628_p8 = scmp.ne.s32.totalorder %s899_s0, %s627_s19  ;;  %p631_p9 = scmp.lt.u32.totalorder %s627_s19, %s899_s0 }
  0x18   :  { %p633_p10 = pnand %p631_p9, %p628_p8 }
  0x1a   :  { %636 = shalt.err (!%p633_p10)
}
  0x1b   :  { %s637_s24 = scalar_lea.vmem %s774_s27, 128  ;;  %p642_p12 = scmp.lt.s32.totalorder %s774_s27, %s774_s27 }
  0x1c   :  { %p638_p11 = scmp.ne.s32.totalorder %s774_s27, %s637_s24  ;;  %p643_p13 = scmp.lt.s32.totalorder %s637_s24, %s637_s24 }
  0x1e   :  { %p644_p0 = por %p643_p13, %p642_p12 }
  0x20   :  { %p645_p1 = pnand %p644_p0, %p638_p11 }
  0x22   :  { %648 = shalt.err (!%p645_p1)
}
  0x23   :  { %27 = dma.hbm_to_vmem [thread:$0]  %s899_s0, 128, %s774_s27, [#allocation3], %s725_s13, %s725_s13, %s726_s14  }
  0x24   :  { %s727_s26 = smov [#allocation7]   ;;  %s728_s29 = smov [#allocation8]  }
  0x25   :  { %s45_s28 = sshll.u32 %s727_s26, 4  ;;  %s57_s30 = sshll.u32 %s728_s29, 4  ;;  %s46_s28 = int_to_ptr.vmem [resolvable:$true] %s45_s28  ;;  %s811_s30 = int_to_ptr.vmem [resolvable:$true] %s57_s30 }
  0x26   :  { %s649_s10 = scalar_lea.hbm %s901_s2, 1024 }
  0x27   :  { %p650_p2 = scmp.ne.s32.totalorder %s901_s2, %s649_s10  ;;  %p653_p3 = scmp.lt.u32.totalorder %s649_s10, %s901_s2 }
  0x29   :  { %p655_p4 = pnand %p653_p3, %p650_p2 }
  0x2b   :  { %658 = shalt.err (!%p655_p4)
}
  0x2c   :  { %s659_s0 = scalar_lea.vmem %s46_s28, 1024  ;;  %p664_p6 = scmp.lt.s32.totalorder %s46_s28, %s46_s28 }
  0x2d   :  { %p660_p5 = scmp.ne.s32.totalorder %s46_s28, %s659_s0  ;;  %p665_p7 = scmp.lt.s32.totalorder %s659_s0, %s659_s0 }
  0x2f   :  { %p666_p8 = por %p665_p7, %p664_p6 }
  0x31   :  { %p667_p9 = pnand %p666_p8, %p660_p5 }
  0x33   :  { %670 = shalt.err (!%p667_p9)
}
  0x34   :  { %51 = dma.hbm_to_vmem [thread:$0]  %s901_s2, 1024, %s46_s28, [#allocation6], %s725_s13, %s725_s13, %s726_s14  }
  0x35   :  { %s671_s20 = scalar_lea.hbm %s902_s3, 1024 }
  0x36   :  { %p672_p10 = scmp.ne.s32.totalorder %s902_s3, %s671_s20  ;;  %p675_p11 = scmp.lt.u32.totalorder %s671_s20, %s902_s3 }
  0x38   :  { %p677_p12 = pnand %p675_p11, %p672_p10 }
  0x3a   :  { %680 = shalt.err (!%p677_p12)
}
  0x3b   :  { %s681_s1 = scalar_lea.vmem %s811_s30, 1024  ;;  %p686_p0 = scmp.lt.s32.totalorder %s811_s30, %s811_s30 }
  0x3c   :  { %p682_p13 = scmp.ne.s32.totalorder %s811_s30, %s681_s1  ;;  %p687_p1 = scmp.lt.s32.totalorder %s681_s1, %s681_s1 }
  0x3e   :  { %p688_p2 = por %p687_p1, %p686_p0 }
  0x40   :  { %p689_p3 = pnand %p688_p2, %p682_p13 }
  0x42   :  { %692 = shalt.err (!%p689_p3)
}
  0x43   :  { %63 = dma.hbm_to_vmem [thread:$0]  %s902_s3, 1024, %s811_s30, [#allocation9], %s725_s13, %s725_s13, %s726_s14  }
  0x44   :  { %715 = dma.done.wait [#allocation3], 128  }
  0x45   :  { %716 = vsyncadd [#allocation3], 4294967168 }
  0x46   :  { %717 = dma.done.wait [#allocation6], 2048  }
  0x47   :  { %718 = vsyncadd [#allocation6], 4294965248 }
  0x48   :  { %719 = dma.done.wait [#allocation9], 1024  }
  0x49   :  { %720 = vsyncadd [#allocation9], 4294966272  ;;  %v729_v0 = vmov 0.0   ;;  %vm730_vm0 = vmmov 0   ;;  %v580_v1 = vld [vmem:[#allocation5] sm:$0xff]   ;;  %v581_v2 = vld [vmem:[#allocation5 + $0x8] sm:$0xff]  }
  0x4a   :  { %509 = vmatprep.subr.bf16.mxu0 %v729_v0  ;;  %525 = vmatprep.mubr.msk.bf16.mxu0 %vm730_vm0, %v729_v0  ;;  %v582_v3 = vld [vmem:[#allocation5 + $0x10] sm:$0xff]   ;;  %v589_v4 = vld [vmem:[#allocation7] sm:$0xff]   ;;  %v583_v5 = vld [vmem:[#allocation5 + $0x18] sm:$0xff]   ;;  %s731_s29 = smov [#allocation10]  }
  0x4b   :  { %529 = vmatprep.subr.bf16.mxu1 %v729_v0  ;;  %545 = vmatprep.mubr.msk.bf16.mxu1 %vm730_vm0, %v729_v0  ;;  %v590_v6 = vld [vmem:[#allocation7 + $0x8] sm:$0xff]   ;;  %v584_v7 = vld [vmem:[#allocation5 + $0x20] sm:$0xff]   ;;  %v591_v8 = vld [vmem:[#allocation7 + $0x10] sm:$0xff]   ;;  %s440_s30 = sshll.u32 %s731_s29, 4  ;;  %s441_s30 = int_to_ptr.vmem [resolvable:$true] %s440_s30 }
  0x4c   :  { %510 = vmatpush3.bf16.msra.mxu0 %v580_v1  ;;  %530 = vmatpush3.bf16.msra.mxu1 %v589_v4  ;;  %v585_v9 = vld [vmem:[#allocation5 + $0x28] sm:$0xff]   ;;  %v592_v10 = vld [vmem:[#allocation7 + $0x18] sm:$0xff]   ;;  %v586_v11 = vld [vmem:[#allocation5 + $0x30] sm:$0xff]   ;;  %p698_p5 = scmp.lt.s32.totalorder %s441_s30, %s441_s30 }
  0x4d   :  { %511 = vmatprep.subr.bf16.mxu0 %v729_v0  ;;  %531 = vmatprep.subr.bf16.mxu1 %v729_v0  ;;  %v593_v12 = vld [vmem:[#allocation7 + $0x20] sm:$0xff]   ;;  %v587_v13 = vld [vmem:[#allocation5 + $0x38] sm:$0xff]   ;;  %v594_v14 = vld [vmem:[#allocation7 + $0x28] sm:$0xff]  }
  0x4e   :  { %v588_v15 = vld [vmem:[#allocation2] sm:$0xff]   ;;  %v595_v16 = vld [vmem:[#allocation7 + $0x30] sm:$0xff]   ;;  %v597_v18 = vld [vmem:[#allocation8] sm:$0xff]  }
  0x4f   :  { %v596_v17 = vld [vmem:[#allocation7 + $0x38] sm:$0xff]   ;;  %v598_v19 = vld [vmem:[#allocation8 + $0x8] sm:$0xff]   ;;  %v599_v20 = vld [vmem:[#allocation8 + $0x10] sm:$0xff]  }
  0x50   :  { %512 = vmatpush3.bf16.msra.mxu0 %v581_v2  ;;  %532 = vmatpush3.bf16.msra.mxu1 %v590_v6  ;;  %v600_v21 = vld [vmem:[#allocation8 + $0x18] sm:$0xff]   ;;  %v601_v22 = vld [vmem:[#allocation8 + $0x20] sm:$0xff]   ;;  %v602_v23 = vld [vmem:[#allocation8 + $0x28] sm:$0xff]  }
  0x51   :  { %513 = vmatprep.subr.bf16.mxu0 %v729_v0  ;;  %533 = vmatprep.subr.bf16.mxu1 %v729_v0  ;;  %v454_v24 = vld [vmem:[%s903_s4] ss:$0 sm:$0xff]  ;;  %v603_v34 = vld [vmem:[#allocation8 + $0x30] sm:$0xff]  }
  0x52   :  { %v604_v35 = vld [vmem:[#allocation8 + $0x38] sm:$0xff]  }
  0x53   :  { %v464_v36 = vld [vmem:[%s904_s5] ss:$0 sm:$0xff]  ;;  %s693_s5 = scalar_lea.vmem %s441_s30, 256 }
  0x54   :  { %514 = vmatpush3.bf16.msra.mxu0 %v582_v3  ;;  %534 = vmatpush3.bf16.msra.mxu1 %v591_v8  ;;  %v473_v46 = vld [vmem:[%s905_s6] ss:$0 sm:$0xff]  ;;  %p694_p4 = scmp.ne.s32.totalorder %s441_s30, %s693_s5  ;;  %p699_p6 = scmp.lt.s32.totalorder %s693_s5, %s693_s5 }
  0x55   :  { %515 = vmatprep.subr.bf16.mxu0 %v729_v0  ;;  %535 = vmatprep.subr.bf16.mxu1 %v729_v0 }
  0x56   :  { %p700_p7 = por %p699_p6, %p698_p5 }
  0x58   :  { %516 = vmatpush3.bf16.msra.mxu0 %v583_v5  ;;  %536 = vmatpush3.bf16.msra.mxu1 %v592_v10  ;;  %p701_p8 = pnand %p700_p7, %p694_p4 }
  0x59   :  { %517 = vmatprep.subr.bf16.mxu0 %v729_v0  ;;  %537 = vmatprep.subr.bf16.mxu1 %v729_v0 }
  0x5c   :  { %518 = vmatpush3.bf16.msra.mxu0 %v584_v7  ;;  %538 = vmatpush3.bf16.msra.mxu1 %v593_v12 }
  0x5d   :  { %519 = vmatprep.subr.bf16.mxu0 %v729_v0  ;;  %539 = vmatprep.subr.bf16.mxu1 %v729_v0 }
  0x60   :  { %520 = vmatpush3.bf16.msra.mxu0 %v585_v9  ;;  %540 = vmatpush3.bf16.msra.mxu1 %v594_v14 }
  0x61   :  { %521 = vmatprep.subr.bf16.mxu0 %v729_v0  ;;  %541 = vmatprep.subr.bf16.mxu1 %v729_v0 }
  0x64   :  { %522 = vmatpush3.bf16.msra.mxu0 %v586_v11  ;;  %542 = vmatpush3.bf16.msra.mxu1 %v595_v16 }
  0x65   :  { %523 = vmatprep.subr.bf16.mxu0 %v729_v0  ;;  %543 = vmatprep.subr.bf16.mxu1 %v729_v0 }
  0x68   :  { %524 = vmatpush3.bf16.msra.mxu0 %v587_v13  ;;  %544 = vmatpush3.bf16.msra.mxu1 %v596_v17 }
  0x69   :  { %549 = vmatprep.subr.bf16.mxu0 %v729_v0 }
  0x6b   :  { %526 = vmatmul.mubr.bf16.vlgmr.msra.gmra.mrb[0].mxu0 %v588_v15 }
  0x6c   :  { %565 = vmatprep.mubr.msk.bf16.mxu0 %vm730_vm0, %v729_v0  ;;  %550 = vmatpush3.bf16.msra.mxu0 %v597_v18 }
  0x6d   :  { %551 = vmatprep.subr.bf16.mxu0 %v729_v0 }
  0x70   :  { %552 = vmatpush3.bf16.msra.mxu0 %v598_v19 }
  0x71   :  { %553 = vmatprep.subr.bf16.mxu0 %v729_v0 }
  0x74   :  { %554 = vmatpush3.bf16.msra.mxu0 %v599_v20 }
  0x75   :  { %555 = vmatprep.subr.bf16.mxu0 %v729_v0 }
  0x78   :  { %556 = vmatpush3.bf16.msra.mxu0 %v600_v21 }
  0x79   :  { %557 = vmatprep.subr.bf16.mxu0 %v729_v0 }
  0x7c   :  { %558 = vmatpush3.bf16.msra.mxu0 %v601_v22 }
  0x7d   :  { %559 = vmatprep.subr.bf16.mxu0 %v729_v0 }
  0x80   :  { %560 = vmatpush3.bf16.msra.mxu0 %v602_v23 }
  0x81   :  { %561 = vmatprep.subr.bf16.mxu0 %v729_v0 }
  0x84   :  { %562 = vmatpush3.bf16.msra.mxu0 %v603_v34 }
  0x85   :  { %563 = vmatprep.subr.bf16.mxu0 %v729_v0 }
  0x88   :  { %564 = vmatpush3.bf16.msra.mxu0 %v604_v35 }
 0x13e   :  { %v196_v25 = vpop.f32.mrb[0].mxu0 }
 0x13f   :  { %v197_v26 = vadd.f32 %v454_v24, %v196_v25  ;;  %v527_v27 = vpop.f32.mrb[1].mxu0 }
 0x140   :  { %v199_v28 = vpop.f32.mrb[2].mxu0 }
 0x141   :  { %v200_v29 = vadd.f32 %v454_v24, %v199_v28  ;;  %v528_v30 = vpop.f32.mrb[3].mxu0  ;;  %v203_v31 = vmax.f32 %v197_v26, 0.0 }
 0x143   :  { %v204_v32 = vmax.f32 %v200_v29, 0.0 }
 0x145   :  { %v205_v33 = vpack.c.bf16 %v204_v32, %v203_v31 }
 0x147   :  { %546 = vmatmul.mubr.bf16.vlgmr.msra.gmra.mrb[0].mxu1 %v205_v33 }
 0x21a   :  { %v311_v37 = vpop.f32.mrb[0].mxu1 }
 0x21b   :  { %v312_v38 = vadd.f32 %v464_v36, %v311_v37  ;;  %v547_v39 = vpop.f32.mrb[1].mxu1 }
 0x21c   :  { %v314_v40 = vpop.f32.mrb[2].mxu1 }
 0x21d   :  { %v315_v41 = vadd.f32 %v464_v36, %v314_v40  ;;  %v548_v42 = vpop.f32.mrb[3].mxu1  ;;  %v318_v43 = vmax.f32 %v312_v38, 0.0 }
 0x21f   :  { %v319_v44 = vmax.f32 %v315_v41, 0.0 }
 0x221   :  { %v320_v45 = vpack.c.bf16 %v319_v44, %v318_v43 }
 0x223   :  { %566 = vmatmul.mubr.bf16.vlgmr.msra.gmra.mrb[4].mxu0 %v320_v45 }
 0x2f6   :  { %v426_v47 = vpop.f32.mrb[4].mxu0 }
 0x2f7   :  { %v427_v48 = vadd.f32 %v473_v46, %v426_v47  ;;  %v567_v49 = vpop.f32.mrb[5].mxu0 }
 0x2f8   :  { %v429_v50 = vpop.f32.mrb[6].mxu0 }
 0x2f9   :  { %433 = vst [vmem:[#allocation10] sm:$0xff] %v427_v48  ;;  %v430_v51 = vadd.f32 %v473_v46, %v429_v50  ;;  %v568_v52 = vpop.f32.mrb[7].mxu0 }
 0x2fb   :  { %434 = vst [vmem:[#allocation10 + $0x8] sm:$0xff] %v430_v51 }
 0x2fc   :  { %704 = shalt.err (!%p701_p8)
}
 0x2fd   :  { %s705_s9 = scalar_lea.hbm %s906_s7, 256 }
 0x2fe   :  { %p706_p9 = scmp.ne.s32.totalorder %s906_s7, %s705_s9  ;;  %p709_p10 = scmp.lt.u32.totalorder %s705_s9, %s906_s7 }
 0x300   :  { %p711_p11 = pnand %p709_p10, %p706_p9 }
 0x302   :  { %714 = shalt.err (!%p711_p11)
}
 0x303   :  { %s732_s16 = smov 128   ;;  %s733_s0 = smov 8  }
 0x304   :  { %446 = dma.vmem_to_hbm [thread:$0]  %s441_s30, 256, %s906_s7, [#allocation4], %s732_s16, %s732_s16, %s733_s0  }
 0x305   :  { %721 = dma.done.wait [#allocation4], 256  }
 0x306   :  { %722 = vsyncadd [#allocation4], 4294967040 }
 0x307   :  { %450 = vsyncpa [#allocation3], 1 }
 0x308   :  { %451 = vsyncpa [#allocation6], 1 }
 0x309   :  { %452 = vsyncpa [#allocation9], 1 }
 0x30a   :  { %453 = vsyncpa [#allocation4], 1 }

</bundles_post_ra>
